<compile_context>
chip_gen: v5e
topology: v5e:2x2
jax: 0.10.0
libtpu: 0.0.40
codegen_flags: <defaults>
</compile_context>

<pallas_src>
import math
from functools import partial

import jax
import jax.numpy as jnp
from jax.experimental import pallas as pl
from jax.experimental.pallas import tpu as pltpu

# Small, self-consistent toy shapes (the module uses n_embd=384, seq=256).
N_EMBD = 32
SEQ_LEN = 8
NUM_HEADS = 4
HEAD_SIZE = N_EMBD // NUM_HEADS
BATCH = 2


def mha_kernel(x_ref, wq_ref, wk_ref, wv_ref, wp_ref, bp_ref, o_ref,
               *, batch_tile, seq_len, num_heads):
    # x_ref block: (batch_tile * T, C) — rows of `batch_tile` batch elements,
    # already flattened so every projection sees a large MXU M dimension.
    x2 = x_ref[...]
    rows, C = x2.shape
    T = seq_len
    cd = x2.dtype                    # MXU operand dtype (f32 or bf16)
    E = o_ref.shape[-1]

    scale = C ** (-0.5)              # matches PyTorch: C ** (-0.5), C = n_embd

    # Additive causal mask, built ONCE per grid step: 0 on/below the diagonal,
    # -1e30 above.  One broadcast add per head instead of a vector select.
    row_id = jax.lax.broadcasted_iota(jnp.int32, (T, T), 0)
    col_id = jax.lax.broadcasted_iota(jnp.int32, (T, T), 1)
    add_mask = jnp.where(row_id >= col_id, 0.0, -1e30).astype(jnp.float32)[None]

    # Output-projection accumulator (f32), initialized with the bias so no
    # separate (rows, E) add is needed at the end.  Accumulating per head
    # removes the feature-axis concatenate entirely.
    acc = jnp.broadcast_to(bp_ref[...], (rows, E)).astype(jnp.float32)

    for h in range(num_heads):
        # Per-head projections.  Weights come in head-major (H, C, D), so
        # wq_ref[h] is a plain leading-axis load — no lane slicing.
        qh = jnp.dot(x2, wq_ref[h], preferred_element_type=jnp.float32) * scale
        kh = jnp.dot(x2, wk_ref[h], preferred_element_type=jnp.float32)
        vh = jnp.dot(x2, wv_ref[h], preferred_element_type=jnp.float32)

        D = qh.shape[-1]
        # (rows, D) -> (batch_tile, T, D): split of the leading (sublane-major)
        # axis only — no lane shuffles.  Attention stays per batch element.
        qh = qh.reshape(batch_tile, T, D).astype(cd)
        kh = kh.reshape(batch_tile, T, D).astype(cd)
        vh = vh.reshape(batch_tile, T, D).astype(cd)

        # Scores: batched contraction over D — K's transpose is absorbed into
        # the dot_general operand load (no kh.T / no XLU transpose).
        s = jnp.einsum('bqd,bkd->bqk', qh, kh,
                       preferred_element_type=jnp.float32)
        s = s + add_mask

        # Numerically-stable softmax in f32; divide via EUP approx reciprocal.
        s = s - jnp.max(s, axis=-1, keepdims=True)
        p = jnp.exp(s)
        p = p * pl.reciprocal(jnp.sum(p, axis=-1, keepdims=True), approx=True)
        # (attention dropout is identity in eval mode)

        oh = jnp.einsum('bqk,bkd->bqd', p.astype(cd), vh,
                        preferred_element_type=jnp.float32)
        oh = oh.reshape(rows, D).astype(cd)

        # This head's slice of the output projection, accumulated in f32.
        acc = acc + jnp.dot(oh, wp_ref[h], preferred_element_type=jnp.float32)

    # (output dropout is identity in eval mode)
    o_ref[...] = acc.astype(o_ref.dtype)
    # TODO(synk): training-mode dropout (p=0.2) not implemented in-kernel.


def multi_head_attention(x, wq, wk, wv, wproj, bproj,
                         num_heads=NUM_HEADS,
                         compute_dtype=jnp.float32,
                         rows_target=256):
    B, T, C = x.shape
    E = wproj.shape[1]
    D = E // num_heads

    # Batch-tile: pack enough batch elements per grid step so the projection
    # matmuls have M >= rows_target rows (MXU-friendly), while keeping the
    # grid an exact divisor of B (multiple grid steps -> both v7x TCs busy
    # at production batch sizes).
    bt = max(1, min(B, -(-rows_target // T)))
    while B % bt:
        bt -= 1
    grid = (B // bt,)

    # Head-major weight layouts (host/XLA side, done once per call):
    #   Wq/Wk/Wv: (C, E) -> (H, C, D);  Wproj: (E, E) -> (H, D, E)
    wq_h = jnp.transpose(wq.reshape(C, num_heads, D), (1, 0, 2)).astype(compute_dtype)
    wk_h = jnp.transpose(wk.reshape(C, num_heads, D), (1, 0, 2)).astype(compute_dtype)
    wv_h = jnp.transpose(wv.reshape(C, num_heads, D), (1, 0, 2)).astype(compute_dtype)
    wp_h = wproj.reshape(num_heads, D, E).astype(compute_dtype)
    bp2 = bproj.reshape(1, E).astype(jnp.float32)

    # Flatten x to lane-dense 2D rows; cast MXU operands (bf16 on v6e/v7x).
    x2 = x.reshape(B * T, C).astype(compute_dtype)

    kernel = partial(mha_kernel, batch_tile=bt, seq_len=T, num_heads=num_heads)

    out2 = pl.pallas_call(
        kernel,
        out_shape=jax.ShapeDtypeStruct((B * T, E), jnp.float32),
        grid_spec=pltpu.PrefetchScalarGridSpec(
            num_scalar_prefetch=0,
            grid=grid,
            in_specs=[
                pl.BlockSpec((bt * T, C), lambda b: (b, 0)),            # x rows
                pl.BlockSpec((num_heads, C, D), lambda b: (0, 0, 0)),   # Wq
                pl.BlockSpec((num_heads, C, D), lambda b: (0, 0, 0)),   # Wk
                pl.BlockSpec((num_heads, C, D), lambda b: (0, 0, 0)),   # Wv
                pl.BlockSpec((num_heads, D, E), lambda b: (0, 0, 0)),   # Wproj
                pl.BlockSpec((1, E), lambda b: (0, 0)),                 # bproj
            ],
            out_specs=pl.BlockSpec((bt * T, E), lambda b: (b, 0)),
        ),
        compiler_params=pltpu.CompilerParams(
            dimension_semantics=("parallel",),
            # Explicit scoped-VMEM budget; safe on v5e/v6e/v7x for these tiles.
            # Sweep together with `rows_target` on v7x (64 MiB physical VMEM)
            # at production sizes.
            vmem_limit_bytes=32 * 1024 * 1024,
        ),
    )(x2, wq_h, wk_h, wv_h, wp_h, bp2)

    return out2.reshape(B, T, E)


def reference_mha(x, wq, wk, wv, wproj, bproj):
    """Pure-JAX reference mirroring the PyTorch forward (eval mode)."""
    B, T, C = x.shape
    q = x @ wq
    k = x @ wk
    v = x @ wv
    mask = jnp.tril(jnp.ones((T, T), dtype=bool))
    outs = []
    for h in range(NUM_HEADS):
        sl = slice(h * HEAD_SIZE, (h + 1) * HEAD_SIZE)
        wei = (q[:, :, sl] @ jnp.swapaxes(k[:, :, sl], -2, -1)) * (C ** -0.5)
        wei = jnp.where(mask[None], wei, -jnp.inf)
        wei = jax.nn.softmax(wei, axis=-1)
        outs.append(wei @ v[:, :, sl])
    out = jnp.concatenate(outs, axis=-1)
    return out @ wproj + bproj


if __name__ == "__main__":
    key = jax.random.PRNGKey(0)
    kx, kq, kk, kv, kp, kb = jax.random.split(key, 6)

    x = jax.random.normal(kx, (BATCH, SEQ_LEN, N_EMBD), dtype=jnp.float32)

    # Deterministic parameter init (uniform, Linear-style scaling).
    lim = 1.0 / math.sqrt(N_EMBD)
    wq = jax.random.uniform(kq, (N_EMBD, NUM_HEADS * HEAD_SIZE), jnp.float32, -lim, lim)
    wk = jax.random.uniform(kk, (N_EMBD, NUM_HEADS * HEAD_SIZE), jnp.float32, -lim, lim)
    wv = jax.random.uniform(kv, (N_EMBD, NUM_HEADS * HEAD_SIZE), jnp.float32, -lim, lim)
    wproj = jax.random.uniform(kp, (N_EMBD, N_EMBD), jnp.float32, -lim, lim)
    bproj = jax.random.uniform(kb, (N_EMBD,), jnp.float32, -lim, lim)

    ref = reference_mha(x, wq, wk, wv, wproj, bproj)

    # f32 MXU path (v5e / tight-accuracy check).
    out = multi_head_attention(x, wq, wk, wv, wproj, bproj)
    out = jax.block_until_ready(out)
    assert out.shape == (BATCH, SEQ_LEN, N_EMBD)
    assert jnp.allclose(out, ref, atol=5e-3, rtol=5e-3), "f32 mismatch vs reference"

    # bf16-operand MXU path (v6e/v7x recommendation): bf16 matmul inputs,
    # f32 accumulation, f32 softmax.
    out_bf16 = multi_head_attention(x, wq, wk, wv, wproj, bproj,
                                    compute_dtype=jnp.bfloat16)
    out_bf16 = jax.block_until_ready(out_bf16)
    assert jnp.allclose(out_bf16, ref, atol=5e-2, rtol=5e-2), "bf16 mismatch vs reference"

    print("KERNEL_OK")
</pallas_src>

<mosaic_0001>
module attributes {stable_mosaic.version = 11 : i64} {
  func.func @mha_kernel(%arg0: i32, %arg1: memref<16x32xf32, #tpu.memory_space<vmem>>, %arg2: memref<4x32x8xf32, #tpu.memory_space<vmem>>, %arg3: memref<4x32x8xf32, #tpu.memory_space<vmem>>, %arg4: memref<4x32x8xf32, #tpu.memory_space<vmem>>, %arg5: memref<4x8x32xf32, #tpu.memory_space<vmem>>, %arg6: memref<1x32xf32, #tpu.memory_space<vmem>>, %arg7: memref<16x32xf32, #tpu.memory_space<vmem>>) attributes {dimension_semantics = [#tpu.dimension_semantics<parallel>], iteration_bounds = array<i64: 1>, scalar_prefetch = 0 : i64, scratch_operands = 0 : i64, tpu.core_type = #tpu.core_type<tc>, window_params = [{transform_indices = @transform_0, window_bounds = array<i64: 16, 32>}, {pipeline_mode = #tpu.pipeline_mode<synchronous>, transform_indices = @transform_1, window_bounds = array<i64: 4, 32, 8>}, {pipeline_mode = #tpu.pipeline_mode<synchronous>, transform_indices = @transform_2, window_bounds = array<i64: 4, 32, 8>}, {pipeline_mode = #tpu.pipeline_mode<synchronous>, transform_indices = @transform_3, window_bounds = array<i64: 4, 32, 8>}, {pipeline_mode = #tpu.pipeline_mode<synchronous>, transform_indices = @transform_4, window_bounds = array<i64: 4, 8, 32>}, {pipeline_mode = #tpu.pipeline_mode<synchronous>, transform_indices = @transform_5, window_bounds = array<i64: 1, 32>}, {transform_indices = @transform_6, window_bounds = array<i64: 16, 32>}]} {
    %c0 = arith.constant 0 : index
    %c0_0 = arith.constant 0 : index
    %0 = vector.load %arg1[%c0, %c0_0] : memref<16x32xf32, #tpu.memory_space<vmem>>, vector<16x32xf32>
    %1 = tpu.iota {dimensions = array<i32: 0>} : vector<8x8xi32>
    %2 = tpu.iota {dimensions = array<i32: 1>} : vector<8x8xi32>
    %3 = arith.cmpi sge, %1, %2 : vector<8x8xi32>
    %cst = arith.constant 0.000000e+00 : f32
    %cst_1 = arith.constant -1.000000e+30 : f32
    %4 = vector.broadcast %cst : f32 to vector<8x8xf32>
    %5 = vector.broadcast %cst_1 : f32 to vector<8x8xf32>
    %6 = arith.select %3, %4, %5 : vector<8x8xi1>, vector<8x8xf32>
    %7 = vector.shape_cast %6 : vector<8x8xf32> to vector<1x8x8xf32>
    %c0_2 = arith.constant 0 : index
    %c0_3 = arith.constant 0 : index
    %8 = vector.load %arg6[%c0_2, %c0_3] : memref<1x32xf32, #tpu.memory_space<vmem>>, vector<1x32xf32>
    %9 = vector.shape_cast %8 : vector<1x32xf32> to vector<1x32xf32>
    %10 = vector.broadcast %9 : vector<1x32xf32> to vector<16x32xf32>
    %c0_4 = arith.constant 0 : index
    %c0_5 = arith.constant 0 : index
    %c0_6 = arith.constant 0 : index
    %11 = vector.load %arg2[%c0_4, %c0_5, %c0_6] : memref<4x32x8xf32, #tpu.memory_space<vmem>>, vector<1x32x8xf32>
    %12 = vector.shape_cast %11 : vector<1x32x8xf32> to vector<32x8xf32>
    %cst_7 = arith.constant dense<0.000000e+00> : vector<16x8xf32>
    %13 = tpu.matmul %0, %12, %cst_7 {dimension_numbers = #tpu.dot_dimension_numbers<[1], [0], [0], [1], [0, 0, 1, 1], [], []>} : vector<16x32xf32>, vector<32x8xf32>, vector<16x8xf32> -> vector<16x8xf32>
    %cst_8 = arith.constant 0.176776692 : f32
    %14 = vector.broadcast %cst_8 : f32 to vector<16x8xf32>
    %15 = arith.mulf %13, %14 : vector<16x8xf32>
    %c0_9 = arith.constant 0 : index
    %c0_10 = arith.constant 0 : index
    %c0_11 = arith.constant 0 : index
    %16 = vector.load %arg3[%c0_9, %c0_10, %c0_11] : memref<4x32x8xf32, #tpu.memory_space<vmem>>, vector<1x32x8xf32>
    %17 = vector.shape_cast %16 : vector<1x32x8xf32> to vector<32x8xf32>
    %cst_12 = arith.constant dense<0.000000e+00> : vector<16x8xf32>
    %18 = tpu.matmul %0, %17, %cst_12 {dimension_numbers = #tpu.dot_dimension_numbers<[1], [0], [0], [1], [0, 0, 1, 1], [], []>} : vector<16x32xf32>, vector<32x8xf32>, vector<16x8xf32> -> vector<16x8xf32>
    %c0_13 = arith.constant 0 : index
    %c0_14 = arith.constant 0 : index
    %c0_15 = arith.constant 0 : index
    %19 = vector.load %arg4[%c0_13, %c0_14, %c0_15] : memref<4x32x8xf32, #tpu.memory_space<vmem>>, vector<1x32x8xf32>
    %20 = vector.shape_cast %19 : vector<1x32x8xf32> to vector<32x8xf32>
    %cst_16 = arith.constant dense<0.000000e+00> : vector<16x8xf32>
    %21 = tpu.matmul %0, %20, %cst_16 {dimension_numbers = #tpu.dot_dimension_numbers<[1], [0], [0], [1], [0, 0, 1, 1], [], []>} : vector<16x32xf32>, vector<32x8xf32>, vector<16x8xf32> -> vector<16x8xf32>
    %22 = vector.shape_cast %15 : vector<16x8xf32> to vector<2x8x8xf32>
    %23 = vector.shape_cast %18 : vector<16x8xf32> to vector<2x8x8xf32>
    %24 = vector.shape_cast %21 : vector<16x8xf32> to vector<2x8x8xf32>
    "tpu.trace_start"() <{level = 10 : i32, message = "bqd,bkd->bqk"}> : () -> ()
    %cst_17 = arith.constant dense<0.000000e+00> : vector<2x8x8xf32>
    %25 = tpu.matmul %22, %23, %cst_17 {dimension_numbers = #tpu.dot_dimension_numbers<[2], [2], [1], [1], [0, 0, 0, 1, 1, 1], [0], [0]>} : vector<2x8x8xf32>, vector<2x8x8xf32>, vector<2x8x8xf32> -> vector<2x8x8xf32>
    "tpu.trace_stop"() : () -> ()
    %26 = vector.broadcast %7 : vector<1x8x8xf32> to vector<2x8x8xf32>
    %27 = arith.addf %25, %26 : vector<2x8x8xf32>
    %cst_18 = arith.constant dense<0xFF800000> : vector<2x8xf32>
    %28 = vector.multi_reduction <maximumf>, %27, %cst_18 [2] : vector<2x8x8xf32> to vector<2x8xf32>
    %29 = vector.shape_cast %28 : vector<2x8xf32> to vector<2x8x1xf32>
    %30 = vector.broadcast %29 : vector<2x8x1xf32> to vector<2x8x8xf32>
    %31 = arith.subf %27, %30 : vector<2x8x8xf32>
    %32 = math.exp %31 : vector<2x8x8xf32>
    %cst_19 = arith.constant dense<0.000000e+00> : vector<2x8xf32>
    %33 = vector.multi_reduction <add>, %32, %cst_19 [2] : vector<2x8x8xf32> to vector<2x8xf32>
    %34 = vector.shape_cast %33 : vector<2x8xf32> to vector<2x8x1xf32>
    %35 = tpu.reciprocal %34 {approx = true} : vector<2x8x1xf32> -> vector<2x8x1xf32>
    %36 = vector.broadcast %35 : vector<2x8x1xf32> to vector<2x8x8xf32>
    %37 = arith.mulf %32, %36 : vector<2x8x8xf32>
    "tpu.trace_start"() <{level = 10 : i32, message = "bqk,bkd->bqd"}> : () -> ()
    %cst_20 = arith.constant dense<0.000000e+00> : vector<2x8x8xf32>
    %38 = tpu.matmul %37, %24, %cst_20 {dimension_numbers = #tpu.dot_dimension_numbers<[2], [1], [1], [2], [0, 0, 0, 1, 1, 2], [0], [0]>} : vector<2x8x8xf32>, vector<2x8x8xf32>, vector<2x8x8xf32> -> vector<2x8x8xf32>
    "tpu.trace_stop"() : () -> ()
    %39 = vector.shape_cast %38 : vector<2x8x8xf32> to vector<16x8xf32>
    %c0_21 = arith.constant 0 : index
    %c0_22 = arith.constant 0 : index
    %c0_23 = arith.constant 0 : index
    %40 = vector.load %arg5[%c0_21, %c0_22, %c0_23] : memref<4x8x32xf32, #tpu.memory_space<vmem>>, vector<1x8x32xf32>
    %41 = vector.shape_cast %40 : vector<1x8x32xf32> to vector<8x32xf32>
    %cst_24 = arith.constant dense<0.000000e+00> : vector<16x32xf32>
    %42 = tpu.matmul %39, %41, %cst_24 {dimension_numbers = #tpu.dot_dimension_numbers<[1], [0], [0], [1], [0, 0, 1, 1], [], []>} : vector<16x8xf32>, vector<8x32xf32>, vector<16x32xf32> -> vector<16x32xf32>
    %43 = arith.addf %10, %42 : vector<16x32xf32>
    %c1 = arith.constant 1 : index
    %c0_25 = arith.constant 0 : index
    %c0_26 = arith.constant 0 : index
    %44 = vector.load %arg2[%c1, %c0_25, %c0_26] : memref<4x32x8xf32, #tpu.memory_space<vmem>>, vector<1x32x8xf32>
    %45 = vector.shape_cast %44 : vector<1x32x8xf32> to vector<32x8xf32>
    %cst_27 = arith.constant dense<0.000000e+00> : vector<16x8xf32>
    %46 = tpu.matmul %0, %45, %cst_27 {dimension_numbers = #tpu.dot_dimension_numbers<[1], [0], [0], [1], [0, 0, 1, 1], [], []>} : vector<16x32xf32>, vector<32x8xf32>, vector<16x8xf32> -> vector<16x8xf32>
    %cst_28 = arith.constant 0.176776692 : f32
    %47 = vector.broadcast %cst_28 : f32 to vector<16x8xf32>
    %48 = arith.mulf %46, %47 : vector<16x8xf32>
    %c1_29 = arith.constant 1 : index
    %c0_30 = arith.constant 0 : index
    %c0_31 = arith.constant 0 : index
    %49 = vector.load %arg3[%c1_29, %c0_30, %c0_31] : memref<4x32x8xf32, #tpu.memory_space<vmem>>, vector<1x32x8xf32>
    %50 = vector.shape_cast %49 : vector<1x32x8xf32> to vector<32x8xf32>
    %cst_32 = arith.constant dense<0.000000e+00> : vector<16x8xf32>
    %51 = tpu.matmul %0, %50, %cst_32 {dimension_numbers = #tpu.dot_dimension_numbers<[1], [0], [0], [1], [0, 0, 1, 1], [], []>} : vector<16x32xf32>, vector<32x8xf32>, vector<16x8xf32> -> vector<16x8xf32>
    %c1_33 = arith.constant 1 : index
    %c0_34 = arith.constant 0 : index
    %c0_35 = arith.constant 0 : index
    %52 = vector.load %arg4[%c1_33, %c0_34, %c0_35] : memref<4x32x8xf32, #tpu.memory_space<vmem>>, vector<1x32x8xf32>
    %53 = vector.shape_cast %52 : vector<1x32x8xf32> to vector<32x8xf32>
    %cst_36 = arith.constant dense<0.000000e+00> : vector<16x8xf32>
    %54 = tpu.matmul %0, %53, %cst_36 {dimension_numbers = #tpu.dot_dimension_numbers<[1], [0], [0], [1], [0, 0, 1, 1], [], []>} : vector<16x32xf32>, vector<32x8xf32>, vector<16x8xf32> -> vector<16x8xf32>
    %55 = vector.shape_cast %48 : vector<16x8xf32> to vector<2x8x8xf32>
    %56 = vector.shape_cast %51 : vector<16x8xf32> to vector<2x8x8xf32>
    %57 = vector.shape_cast %54 : vector<16x8xf32> to vector<2x8x8xf32>
    "tpu.trace_start"() <{level = 10 : i32, message = "bqd,bkd->bqk"}> : () -> ()
    %cst_37 = arith.constant dense<0.000000e+00> : vector<2x8x8xf32>
    %58 = tpu.matmul %55, %56, %cst_37 {dimension_numbers = #tpu.dot_dimension_numbers<[2], [2], [1], [1], [0, 0, 0, 1, 1, 1], [0], [0]>} : vector<2x8x8xf32>, vector<2x8x8xf32>, vector<2x8x8xf32> -> vector<2x8x8xf32>
    "tpu.trace_stop"() : () -> ()
    %59 = vector.broadcast %7 : vector<1x8x8xf32> to vector<2x8x8xf32>
    %60 = arith.addf %58, %59 : vector<2x8x8xf32>
    %cst_38 = arith.constant dense<0xFF800000> : vector<2x8xf32>
    %61 = vector.multi_reduction <maximumf>, %60, %cst_38 [2] : vector<2x8x8xf32> to vector<2x8xf32>
    %62 = vector.shape_cast %61 : vector<2x8xf32> to vector<2x8x1xf32>
    %63 = vector.broadcast %62 : vector<2x8x1xf32> to vector<2x8x8xf32>
    %64 = arith.subf %60, %63 : vector<2x8x8xf32>
    %65 = math.exp %64 : vector<2x8x8xf32>
    %cst_39 = arith.constant dense<0.000000e+00> : vector<2x8xf32>
    %66 = vector.multi_reduction <add>, %65, %cst_39 [2] : vector<2x8x8xf32> to vector<2x8xf32>
    %67 = vector.shape_cast %66 : vector<2x8xf32> to vector<2x8x1xf32>
    %68 = tpu.reciprocal %67 {approx = true} : vector<2x8x1xf32> -> vector<2x8x1xf32>
    %69 = vector.broadcast %68 : vector<2x8x1xf32> to vector<2x8x8xf32>
    %70 = arith.mulf %65, %69 : vector<2x8x8xf32>
    "tpu.trace_start"() <{level = 10 : i32, message = "bqk,bkd->bqd"}> : () -> ()
    %cst_40 = arith.constant dense<0.000000e+00> : vector<2x8x8xf32>
    %71 = tpu.matmul %70, %57, %cst_40 {dimension_numbers = #tpu.dot_dimension_numbers<[2], [1], [1], [2], [0, 0, 0, 1, 1, 2], [0], [0]>} : vector<2x8x8xf32>, vector<2x8x8xf32>, vector<2x8x8xf32> -> vector<2x8x8xf32>
    "tpu.trace_stop"() : () -> ()
    %72 = vector.shape_cast %71 : vector<2x8x8xf32> to vector<16x8xf32>
    %c1_41 = arith.constant 1 : index
    %c0_42 = arith.constant 0 : index
    %c0_43 = arith.constant 0 : index
    %73 = vector.load %arg5[%c1_41, %c0_42, %c0_43] : memref<4x8x32xf32, #tpu.memory_space<vmem>>, vector<1x8x32xf32>
    %74 = vector.shape_cast %73 : vector<1x8x32xf32> to vector<8x32xf32>
    %cst_44 = arith.constant dense<0.000000e+00> : vector<16x32xf32>
    %75 = tpu.matmul %72, %74, %cst_44 {dimension_numbers = #tpu.dot_dimension_numbers<[1], [0], [0], [1], [0, 0, 1, 1], [], []>} : vector<16x8xf32>, vector<8x32xf32>, vector<16x32xf32> -> vector<16x32xf32>
    %76 = arith.addf %43, %75 : vector<16x32xf32>
    %c2 = arith.constant 2 : index
    %c0_45 = arith.constant 0 : index
    %c0_46 = arith.constant 0 : index
    %77 = vector.load %arg2[%c2, %c0_45, %c0_46] : memref<4x32x8xf32, #tpu.memory_space<vmem>>, vector<1x32x8xf32>
    %78 = vector.shape_cast %77 : vector<1x32x8xf32> to vector<32x8xf32>
    %cst_47 = arith.constant dense<0.000000e+00> : vector<16x8xf32>
    %79 = tpu.matmul %0, %78, %cst_47 {dimension_numbers = #tpu.dot_dimension_numbers<[1], [0], [0], [1], [0, 0, 1, 1], [], []>} : vector<16x32xf32>, vector<32x8xf32>, vector<16x8xf32> -> vector<16x8xf32>
    %cst_48 = arith.constant 0.176776692 : f32
    %80 = vector.broadcast %cst_48 : f32 to vector<16x8xf32>
    %81 = arith.mulf %79, %80 : vector<16x8xf32>
    %c2_49 = arith.constant 2 : index
    %c0_50 = arith.constant 0 : index
    %c0_51 = arith.constant 0 : index
    %82 = vector.load %arg3[%c2_49, %c0_50, %c0_51] : memref<4x32x8xf32, #tpu.memory_space<vmem>>, vector<1x32x8xf32>
    %83 = vector.shape_cast %82 : vector<1x32x8xf32> to vector<32x8xf32>
    %cst_52 = arith.constant dense<0.000000e+00> : vector<16x8xf32>
    %84 = tpu.matmul %0, %83, %cst_52 {dimension_numbers = #tpu.dot_dimension_numbers<[1], [0], [0], [1], [0, 0, 1, 1], [], []>} : vector<16x32xf32>, vector<32x8xf32>, vector<16x8xf32> -> vector<16x8xf32>
    %c2_53 = arith.constant 2 : index
    %c0_54 = arith.constant 0 : index
    %c0_55 = arith.constant 0 : index
    %85 = vector.load %arg4[%c2_53, %c0_54, %c0_55] : memref<4x32x8xf32, #tpu.memory_space<vmem>>, vector<1x32x8xf32>
    %86 = vector.shape_cast %85 : vector<1x32x8xf32> to vector<32x8xf32>
    %cst_56 = arith.constant dense<0.000000e+00> : vector<16x8xf32>
    %87 = tpu.matmul %0, %86, %cst_56 {dimension_numbers = #tpu.dot_dimension_numbers<[1], [0], [0], [1], [0, 0, 1, 1], [], []>} : vector<16x32xf32>, vector<32x8xf32>, vector<16x8xf32> -> vector<16x8xf32>
    %88 = vector.shape_cast %81 : vector<16x8xf32> to vector<2x8x8xf32>
    %89 = vector.shape_cast %84 : vector<16x8xf32> to vector<2x8x8xf32>
    %90 = vector.shape_cast %87 : vector<16x8xf32> to vector<2x8x8xf32>
    "tpu.trace_start"() <{level = 10 : i32, message = "bqd,bkd->bqk"}> : () -> ()
    %cst_57 = arith.constant dense<0.000000e+00> : vector<2x8x8xf32>
    %91 = tpu.matmul %88, %89, %cst_57 {dimension_numbers = #tpu.dot_dimension_numbers<[2], [2], [1], [1], [0, 0, 0, 1, 1, 1], [0], [0]>} : vector<2x8x8xf32>, vector<2x8x8xf32>, vector<2x8x8xf32> -> vector<2x8x8xf32>
    "tpu.trace_stop"() : () -> ()
    %92 = vector.broadcast %7 : vector<1x8x8xf32> to vector<2x8x8xf32>
    %93 = arith.addf %91, %92 : vector<2x8x8xf32>
    %cst_58 = arith.constant dense<0xFF800000> : vector<2x8xf32>
    %94 = vector.multi_reduction <maximumf>, %93, %cst_58 [2] : vector<2x8x8xf32> to vector<2x8xf32>
    %95 = vector.shape_cast %94 : vector<2x8xf32> to vector<2x8x1xf32>
    %96 = vector.broadcast %95 : vector<2x8x1xf32> to vector<2x8x8xf32>
    %97 = arith.subf %93, %96 : vector<2x8x8xf32>
    %98 = math.exp %97 : vector<2x8x8xf32>
    %cst_59 = arith.constant dense<0.000000e+00> : vector<2x8xf32>
    %99 = vector.multi_reduction <add>, %98, %cst_59 [2] : vector<2x8x8xf32> to vector<2x8xf32>
    %100 = vector.shape_cast %99 : vector<2x8xf32> to vector<2x8x1xf32>
    %101 = tpu.reciprocal %100 {approx = true} : vector<2x8x1xf32> -> vector<2x8x1xf32>
    %102 = vector.broadcast %101 : vector<2x8x1xf32> to vector<2x8x8xf32>
    %103 = arith.mulf %98, %102 : vector<2x8x8xf32>
    "tpu.trace_start"() <{level = 10 : i32, message = "bqk,bkd->bqd"}> : () -> ()
    %cst_60 = arith.constant dense<0.000000e+00> : vector<2x8x8xf32>
    %104 = tpu.matmul %103, %90, %cst_60 {dimension_numbers = #tpu.dot_dimension_numbers<[2], [1], [1], [2], [0, 0, 0, 1, 1, 2], [0], [0]>} : vector<2x8x8xf32>, vector<2x8x8xf32>, vector<2x8x8xf32> -> vector<2x8x8xf32>
    "tpu.trace_stop"() : () -> ()
    %105 = vector.shape_cast %104 : vector<2x8x8xf32> to vector<16x8xf32>
    %c2_61 = arith.constant 2 : index
    %c0_62 = arith.constant 0 : index
    %c0_63 = arith.constant 0 : index
    %106 = vector.load %arg5[%c2_61, %c0_62, %c0_63] : memref<4x8x32xf32, #tpu.memory_space<vmem>>, vector<1x8x32xf32>
    %107 = vector.shape_cast %106 : vector<1x8x32xf32> to vector<8x32xf32>
    %cst_64 = arith.constant dense<0.000000e+00> : vector<16x32xf32>
    %108 = tpu.matmul %105, %107, %cst_64 {dimension_numbers = #tpu.dot_dimension_numbers<[1], [0], [0], [1], [0, 0, 1, 1], [], []>} : vector<16x8xf32>, vector<8x32xf32>, vector<16x32xf32> -> vector<16x32xf32>
    %109 = arith.addf %76, %108 : vector<16x32xf32>
    %c3 = arith.constant 3 : index
    %c0_65 = arith.constant 0 : index
    %c0_66 = arith.constant 0 : index
    %110 = vector.load %arg2[%c3, %c0_65, %c0_66] : memref<4x32x8xf32, #tpu.memory_space<vmem>>, vector<1x32x8xf32>
    %111 = vector.shape_cast %110 : vector<1x32x8xf32> to vector<32x8xf32>
    %cst_67 = arith.constant dense<0.000000e+00> : vector<16x8xf32>
    %112 = tpu.matmul %0, %111, %cst_67 {dimension_numbers = #tpu.dot_dimension_numbers<[1], [0], [0], [1], [0, 0, 1, 1], [], []>} : vector<16x32xf32>, vector<32x8xf32>, vector<16x8xf32> -> vector<16x8xf32>
    %cst_68 = arith.constant 0.176776692 : f32
    %113 = vector.broadcast %cst_68 : f32 to vector<16x8xf32>
    %114 = arith.mulf %112, %113 : vector<16x8xf32>
    %c3_69 = arith.constant 3 : index
    %c0_70 = arith.constant 0 : index
    %c0_71 = arith.constant 0 : index
    %115 = vector.load %arg3[%c3_69, %c0_70, %c0_71] : memref<4x32x8xf32, #tpu.memory_space<vmem>>, vector<1x32x8xf32>
    %116 = vector.shape_cast %115 : vector<1x32x8xf32> to vector<32x8xf32>
    %cst_72 = arith.constant dense<0.000000e+00> : vector<16x8xf32>
    %117 = tpu.matmul %0, %116, %cst_72 {dimension_numbers = #tpu.dot_dimension_numbers<[1], [0], [0], [1], [0, 0, 1, 1], [], []>} : vector<16x32xf32>, vector<32x8xf32>, vector<16x8xf32> -> vector<16x8xf32>
    %c3_73 = arith.constant 3 : index
    %c0_74 = arith.constant 0 : index
    %c0_75 = arith.constant 0 : index
    %118 = vector.load %arg4[%c3_73, %c0_74, %c0_75] : memref<4x32x8xf32, #tpu.memory_space<vmem>>, vector<1x32x8xf32>
    %119 = vector.shape_cast %118 : vector<1x32x8xf32> to vector<32x8xf32>
    %cst_76 = arith.constant dense<0.000000e+00> : vector<16x8xf32>
    %120 = tpu.matmul %0, %119, %cst_76 {dimension_numbers = #tpu.dot_dimension_numbers<[1], [0], [0], [1], [0, 0, 1, 1], [], []>} : vector<16x32xf32>, vector<32x8xf32>, vector<16x8xf32> -> vector<16x8xf32>
    %121 = vector.shape_cast %114 : vector<16x8xf32> to vector<2x8x8xf32>
    %122 = vector.shape_cast %117 : vector<16x8xf32> to vector<2x8x8xf32>
    %123 = vector.shape_cast %120 : vector<16x8xf32> to vector<2x8x8xf32>
    "tpu.trace_start"() <{level = 10 : i32, message = "bqd,bkd->bqk"}> : () -> ()
    %cst_77 = arith.constant dense<0.000000e+00> : vector<2x8x8xf32>
    %124 = tpu.matmul %121, %122, %cst_77 {dimension_numbers = #tpu.dot_dimension_numbers<[2], [2], [1], [1], [0, 0, 0, 1, 1, 1], [0], [0]>} : vector<2x8x8xf32>, vector<2x8x8xf32>, vector<2x8x8xf32> -> vector<2x8x8xf32>
    "tpu.trace_stop"() : () -> ()
    %125 = vector.broadcast %7 : vector<1x8x8xf32> to vector<2x8x8xf32>
    %126 = arith.addf %124, %125 : vector<2x8x8xf32>
    %cst_78 = arith.constant dense<0xFF800000> : vector<2x8xf32>
    %127 = vector.multi_reduction <maximumf>, %126, %cst_78 [2] : vector<2x8x8xf32> to vector<2x8xf32>
    %128 = vector.shape_cast %127 : vector<2x8xf32> to vector<2x8x1xf32>
    %129 = vector.broadcast %128 : vector<2x8x1xf32> to vector<2x8x8xf32>
    %130 = arith.subf %126, %129 : vector<2x8x8xf32>
    %131 = math.exp %130 : vector<2x8x8xf32>
    %cst_79 = arith.constant dense<0.000000e+00> : vector<2x8xf32>
    %132 = vector.multi_reduction <add>, %131, %cst_79 [2] : vector<2x8x8xf32> to vector<2x8xf32>
    %133 = vector.shape_cast %132 : vector<2x8xf32> to vector<2x8x1xf32>
    %134 = tpu.reciprocal %133 {approx = true} : vector<2x8x1xf32> -> vector<2x8x1xf32>
    %135 = vector.broadcast %134 : vector<2x8x1xf32> to vector<2x8x8xf32>
    %136 = arith.mulf %131, %135 : vector<2x8x8xf32>
    "tpu.trace_start"() <{level = 10 : i32, message = "bqk,bkd->bqd"}> : () -> ()
    %cst_80 = arith.constant dense<0.000000e+00> : vector<2x8x8xf32>
    %137 = tpu.matmul %136, %123, %cst_80 {dimension_numbers = #tpu.dot_dimension_numbers<[2], [1], [1], [2], [0, 0, 0, 1, 1, 2], [0], [0]>} : vector<2x8x8xf32>, vector<2x8x8xf32>, vector<2x8x8xf32> -> vector<2x8x8xf32>
    "tpu.trace_stop"() : () -> ()
    %138 = vector.shape_cast %137 : vector<2x8x8xf32> to vector<16x8xf32>
    %c3_81 = arith.constant 3 : index
    %c0_82 = arith.constant 0 : index
    %c0_83 = arith.constant 0 : index
    %139 = vector.load %arg5[%c3_81, %c0_82, %c0_83] : memref<4x8x32xf32, #tpu.memory_space<vmem>>, vector<1x8x32xf32>
    %140 = vector.shape_cast %139 : vector<1x8x32xf32> to vector<8x32xf32>
    %cst_84 = arith.constant dense<0.000000e+00> : vector<16x32xf32>
    %141 = tpu.matmul %138, %140, %cst_84 {dimension_numbers = #tpu.dot_dimension_numbers<[1], [0], [0], [1], [0, 0, 1, 1], [], []>} : vector<16x8xf32>, vector<8x32xf32>, vector<16x32xf32> -> vector<16x32xf32>
    %142 = arith.addf %109, %141 : vector<16x32xf32>
    %c0_85 = arith.constant 0 : index
    %c0_86 = arith.constant 0 : index
    %143 = vector.load %arg7[%c0_85, %c0_86] : memref<16x32xf32, #tpu.memory_space<vmem>>, vector<16x32xf32>
    tpu.vector_store %arg7[%c0_85, %c0_86], %142 {strides = array<i32>} : memref<16x32xf32, #tpu.memory_space<vmem>>, vector<16x32xf32>,
    return
  }
  func.func @transform_0(%arg0: i32) -> (i32, i32) {
    %c0_i32 = arith.constant 0 : i32
    %c0_i32_0 = arith.constant 0 : i32
    return %arg0, %c0_i32 : i32, i32
  }
  func.func @transform_1(%arg0: i32) -> (i32, i32, i32) {
    %c0_i32 = arith.constant 0 : i32
    %c0_i32_0 = arith.constant 0 : i32
    %c0_i32_1 = arith.constant 0 : i32
    %c0_i32_2 = arith.constant 0 : i32
    return %c0_i32, %c0_i32_0, %c0_i32_1 : i32, i32, i32
  }
  func.func @transform_2(%arg0: i32) -> (i32, i32, i32) {
    %c0_i32 = arith.constant 0 : i32
    %c0_i32_0 = arith.constant 0 : i32
    %c0_i32_1 = arith.constant 0 : i32
    %c0_i32_2 = arith.constant 0 : i32
    return %c0_i32, %c0_i32_0, %c0_i32_1 : i32, i32, i32
  }
  func.func @transform_3(%arg0: i32) -> (i32, i32, i32) {
    %c0_i32 = arith.constant 0 : i32
    %c0_i32_0 = arith.constant 0 : i32
    %c0_i32_1 = arith.constant 0 : i32
    %c0_i32_2 = arith.constant 0 : i32
    return %c0_i32, %c0_i32_0, %c0_i32_1 : i32, i32, i32
  }
  func.func @transform_4(%arg0: i32) -> (i32, i32, i32) {
    %c0_i32 = arith.constant 0 : i32
    %c0_i32_0 = arith.constant 0 : i32
    %c0_i32_1 = arith.constant 0 : i32
    %c0_i32_2 = arith.constant 0 : i32
    return %c0_i32, %c0_i32_0, %c0_i32_1 : i32, i32, i32
  }
  func.func @transform_5(%arg0: i32) -> (i32, i32) {
    %c0_i32 = arith.constant 0 : i32
    %c0_i32_0 = arith.constant 0 : i32
    %c0_i32_1 = arith.constant 0 : i32
    return %c0_i32, %c0_i32_0 : i32, i32
  }
  func.func @transform_6(%arg0: i32) -> (i32, i32) {
    %c0_i32 = arith.constant 0 : i32
    %c0_i32_0 = arith.constant 0 : i32
    return %arg0, %c0_i32 : i32, i32
  }
}

</mosaic_0001>

<bundles_post_ra>
// kernel: tpu_custom_call.1
= control target key start
LH: loop header
LB: loop body
LE: loop exit
PB: predicated region body
PF: predicated region fallthrough
CT: control target
= control target key end

     0   :  { %s1509_s0 = inlined_call_operand.vmem [shape: f32[16,32], index: 0, kind: input, shape index: {}]   ;;  %s1510_s1 = inlined_call_operand.vmem [shape: f32[4,32,8], index: 1, kind: input, shape index: {}]   ;;  %s1511_s2 = inlined_call_operand.vmem [shape: f32[4,32,8], index: 2, kind: input, shape index: {}]   ;;  %s1512_s3 = inlined_call_operand.vmem [shape: f32[4,32,8], index: 3, kind: input, shape index: {}]   ;;  %s1513_s4 = inlined_call_operand.vmem [shape: f32[4,8,32], index: 4, kind: input, shape index: {}]   ;;  %s1514_s5 = inlined_call_operand.vmem [shape: f32[1,32], index: 5, kind: input, shape index: {}]   ;;  %s1515_s6 = inlined_call_operand.hbm [shape: f32[16,32], index: 6, kind: output, shape index: {}]  }
   0x1   :  { %v75_v0 = vld [vmem:[%s1511_s2 + $0x18] sm:$0xff]  ;;  %v74_v2 = vld [vmem:[%s1511_s2 + $0x10] sm:$0xff]  ;;  %v73_v4 = vld [vmem:[%s1511_s2 + $0x8] sm:$0xff] }
   0x2   :  { %v39_v1 = vld [vmem:[%s1510_s1 + $0x18] sm:$0xff]  ;;  %88 = vmatpush.msra.mxu1 %v75_v0  ;;  %v38_v3 = vld [vmem:[%s1510_s1 + $0x10] sm:$0xff]  ;;  %1111 = vmatpush.msra.mxu2 %v75_v0  ;;  %v37_v5 = vld [vmem:[%s1510_s1 + $0x8] sm:$0xff] }
   0x3   :  { %59 = vmatpush.msra.mxu0 %v39_v1 }
   0x4   :  { %89 = vmatpush.msra.mxu1 %v74_v2 }
   0x5   :  { %60 = vmatpush.msra.mxu0 %v38_v3 }
   0x6   :  { %11 = vsyncpa [#allocation3], 0  ;;  %1112 = vmatpush.msra.mxu2 %v74_v2  ;;  %v72_v6 = vld [vmem:[%s1511_s2] sm:$0xff]  ;;  %90 = vmatpush.msra.mxu1 %v73_v4  ;;  %vm40_vm0 = vcmask 261120   ;;  %v1249_v9 = vld [vmem:[%s1509_s0 + $0x8] sm:$0xff]  ;;  %vm126_vm1 = vcmask 64512   ;;  %v26_v18 = vlaneseq }
   0x7   :  { %v36_v7 = vld [vmem:[%s1510_s1] sm:$0xff]  ;;  %61 = vmatpush.msra.mxu0 %v37_v5  ;;  %v102_v16 = vld [vmem:[%s1512_s3 + $0x18] sm:$0xff]  ;;  %v101_v17 = vld [vmem:[%s1512_s3 + $0x10] sm:$0xff]  ;;  %v1178_v21 = vmov -1e+30   ;;  %s1179_s26 = smov [#allocation2]  }
   0x8   :  { %v1244_v8 = vld [vmem:[%s1509_s0] sm:$0xff]  ;;  %1113 = vmatpush.msra.mxu2 %v73_v4  ;;  %91 = vmatpush.msra.mxu1 %v72_v6  ;;  %v27_v19 = vshrl.u32 %v26_v18, 7  ;;  %v29_v20 = vand.u32 127, %v26_v18  ;;  %v100_v29 = vld [vmem:[%s1512_s3 + $0x8] sm:$0xff]  ;;  %v1039_v42 = vld [vmem:[%s1511_s2 + $0x38] sm:$0xff]  ;;  %s1002_s27 = sshll.u32 %s1179_s26, 4  ;;  %s1003_s27 = int_to_ptr.vmem [resolvable:$true] %s1002_s27 }
   0x9   :  { %62 = vmatpush.msra.mxu0 %v36_v7  ;;  %1018 = vmatmul.msk.f32.vlgmr.msra.gmra.mxu1 %vm40_vm0, %v1244_v8  ;;  %v99_v30 = vld [vmem:[%s1512_s3] sm:$0xff]  ;;  %v1033_v43 = vld [vmem:[%s1510_s1 + $0x38] sm:$0xff]  ;;  %v1038_v44 = vld [vmem:[%s1511_s2 + $0x30] sm:$0xff]  ;;  %s1004_s30 = sshll.u32 %s1515_s6, 4  ;;  %s1181_s7 = smov 8   ;;  %s1005_s30 = int_to_ptr.hbm [resolvable:$true] %s1004_s30 }
   0xa   :  { %1016 = vmatmul.msk.f32.vlgmr.msra.gmra.mxu0 %vm40_vm0, %v1244_v8  ;;  %1114 = vmatpush.msra.mxu2 %v72_v6  ;;  %vm30_vm2 = vcmp.ge.s32.totalorder %v27_v19, %v29_v20  ;;  %v1032_v45 = vld [vmem:[%s1510_s1 + $0x30] sm:$0xff]  ;;  %v1037_v46 = vld [vmem:[%s1511_s2 + $0x28] sm:$0xff]  ;;  %v1036_v48 = vld [vmem:[%s1511_s2 + $0x20] sm:$0xff] }
   0xb   :  { %1019 = vmatmul.msk.f32.vlgmr.msra.gmra.mxu2 %vm40_vm0, %v1249_v9  ;;  %v1269_v22 = vsel %vm30_vm2, 0.0, %v1178_v21  ;;  %v1031_v47 = vld [vmem:[%s1510_s1 + $0x28] sm:$0xff]  ;;  %v1030_v50 = vld [vmem:[%s1510_s1 + $0x20] sm:$0xff]  ;;  %v1045_v2 = vld [vmem:[%s1512_s3 + $0x38] sm:$0xff] }
   0xc   :  { %115 = vmatpush.msrb.mxu2 %v102_v16  ;;  %v247_v57 = vld [vmem:[%s1513_s4] sm:$0xff]  ;;  %v1044_v3 = vld [vmem:[%s1512_s3 + $0x30] sm:$0xff] }
   0xd   :  { %269 = vmatpush.msrb.mxu1 %v247_v57 }
   0xe   :  { %116 = vmatpush.msrb.mxu2 %v101_v17 }
  0x10   :  { %117 = vmatpush.msrb.mxu2 %v100_v29  ;;  %v1060_v29 = vld [vmem:[%s1510_s1 + $0x58] sm:$0xff] }
  0x12   :  { %1017 = vmatmul.msk.f32.gmra.mxu0 %vm40_vm0, %v1249_v9  ;;  %118 = vmatpush.msrb.mxu2 %v99_v30  ;;  %v1065_v30 = vld [vmem:[%s1511_s2 + $0x50] sm:$0xff] }
  0x13   :  { %1020 = vmatmul.msk.f32.vlgmr.msrb.gmra.mxu2 %vm40_vm0, %v1244_v8 }
  0x14   :  { %296 = vmatpush.msra.mxu2 %v1033_v43  ;;  %v1054_v43 = vld [vmem:[%s1513_s4 + $0x8] sm:$0xff] }
  0x16   :  { %297 = vmatpush.msra.mxu2 %v1032_v45 }
  0x18   :  { %298 = vmatpush.msra.mxu2 %v1031_v47 }
  0x1a   :  { %299 = vmatpush.msra.mxu2 %v1030_v50 }
  0x1b   :  { %1021 = vmatmul.msk.f32.gmra.mxu2 %vm40_vm0, %v1249_v9 }
  0x23   :  { %1034 = vmatmul.msk.f32.vlgmr.msra.gmra.mxu2 %vm40_vm0, %v1244_v8 }
  0x2b   :  { %1035 = vmatmul.msk.f32.gmra.mxu2 %vm40_vm0, %v1249_v9 }
  0x86   :  { %v93_v10 = vpop.f32.mrf.mxu1 }
  0x87   :  { %v64_v11 = vpop.f32.mrf.mxu0  ;;  %1022 = vmatpush.xpose.msk.msra.mxu3 %vm126_vm1, %v93_v10 }
  0x88   :  { %v70_v12 = vmul.f32 0.17677669, %v64_v11 }
  0x8a   :  { %1023 = vmatmul.msk.f32.vlgmr.msra.gmra.mxu3 %vm126_vm1, %v70_v12 }
  0x8e   :  { %v96_v13 = vpop.f32.mrf.mxu2 }
  0x8f   :  { %v67_v14 = vpop.f32.mrf.mxu0  ;;  %1024 = vmatpush.xpose.msk.msrb.mxu3 %vm126_vm1, %v96_v13 }
  0x90   :  { %v71_v15 = vmul.f32 0.17677669, %v67_v14  ;;  %v1043_v14 = vld [vmem:[%s1512_s3 + $0x28] sm:$0xff] }
  0x92   :  { %1025 = vmatmul.msk.f32.vlgmr.msrb.gmra.mxu3 %vm126_vm1, %v71_v15  ;;  %v1042_v15 = vld [vmem:[%s1512_s3 + $0x20] sm:$0xff] }
  0x96   :  { %v120_v41 = vpop.f32.mrf.mxu2 }
  0x97   :  { %219 = vmatpush.msra.mxu3 %v120_v41 }
  0x99   :  { %326 = vmatpush.msrb.mxu3 %v1039_v42 }
  0x9b   :  { %327 = vmatpush.msrb.mxu3 %v1038_v44 }
  0x9d   :  { %328 = vmatpush.msrb.mxu3 %v1037_v46 }
  0x9e   :  { %v123_v49 = vpop.f32.mrf.mxu2 }
  0x9f   :  { %242 = vmatpush.msrb.mxu0 %v123_v49  ;;  %329 = vmatpush.msrb.mxu3 %v1036_v48 }
  0xa1   :  { %354 = vmatpush.msra.mxu0 %v1045_v2 }
  0xa3   :  { %355 = vmatpush.msra.mxu0 %v1044_v3  ;;  %v1070_v3 = vld [vmem:[%s1512_s3 + $0x48] sm:$0xff] }
  0xa5   :  { %356 = vmatpush.msra.mxu0 %v1043_v14 }
  0xa6   :  { %v301_v59 = vpop.f32.mrf.mxu2 }
  0xa7   :  { %v307_v62 = vmul.f32 0.17677669, %v301_v59  ;;  %357 = vmatpush.msra.mxu0 %v1042_v15 }
  0xae   :  { %v304_v63 = vpop.f32.mrf.mxu2 }
  0xaf   :  { %v308_v1 = vmul.f32 0.17677669, %v304_v63 }
 0x10d   :  { %v150_v23 = vpop.f32.mrf.mxu3 }
 0x10e   :  { %v151_v24 = vadd.f32 %v150_v23, %v1269_v22 }
 0x110   :  { %v179_v25 = vsel %vm126_vm1, %v151_v24, -inf }
 0x111   :  { %180 = vmax.xlane.f32.xlu0 %v179_v25 }
 0x115   :  { %v176_v26 = vpop.f32.mrf.mxu3 }
 0x116   :  { %v177_v27 = vadd.f32 %v176_v26, %v1269_v22 }
 0x118   :  { %v182_v28 = vsel %vm126_vm1, %v177_v27, -inf }
 0x119   :  { %183 = vmax.xlane.f32.xlu0 %v182_v28  ;;  %v1066_v28 = vld [vmem:[%s1511_s2 + $0x58] sm:$0xff] }
 0x184   :  { %v181_v31 = vpop.xlane.xlu0 %180 }
 0x185   :  { %v185_v32 = vsub.f32 %v151_v24, %v181_v31  ;;  %v1059_v31 = vld [vmem:[%s1510_s1 + $0x50] sm:$0xff] }
 0x187   :  { %v187_v33 = vmul.f32 1.442695, %v185_v32  ;;  %v1064_v32 = vld [vmem:[%s1511_s2 + $0x48] sm:$0xff] }
 0x189   :  { %1120 = vpow2.f32 %v187_v33  ;;  %v1058_v33 = vld [vmem:[%s1510_s1 + $0x48] sm:$0xff] }
 0x18c   :  { %v184_v34 = vpop.xlane.xlu0 %183 }
 0x18d   :  { %v186_v35 = vsub.f32 %v177_v27, %v184_v34  ;;  %v1063_v34 = vld [vmem:[%s1511_s2 + $0x40] sm:$0xff] }
 0x18f   :  { %v1121_v36 = vpop.eup %1120  ;;  %v189_v37 = vmul.f32 1.442695, %v186_v35 }
 0x190   :  { %v191_v38 = vsel %vm126_vm1, %v1121_v36, 0.0 }
 0x191   :  { %1122 = vpow2.f32 %v189_v37  ;;  %192 = vadd.xlane.f32.xlu1 %v191_v38 }
 0x197   :  { %v1123_v39 = vpop.eup %1122 }
 0x198   :  { %v194_v40 = vsel %vm126_vm1, %v1123_v39, 0.0 }
 0x199   :  { %195 = vadd.xlane.f32.xlu1 %v194_v40 }
 0x204   :  { %v193_v51 = vpop.xlane.xlu1 %192 }
 0x205   :  { %1124 = vrcp.f32 %v193_v51 }
 0x20b   :  { %v1125_v52 = vpop.eup %1124 }
 0x20c   :  { %v199_v53 = vmul.f32 %v1125_v52, %v1121_v36  ;;  %v196_v54 = vpop.xlane.xlu1 %195  ;;  %v1057_v36 = vld [vmem:[%s1510_s1 + $0x40] sm:$0xff] }
 0x20d   :  { %1126 = vrcp.f32 %v196_v54  ;;  %v1119_v52 = vld [vmem:[%s1514_s5] ss:$0 sm:$0xff]  ;;  %v1071_v54 = vld [vmem:[%s1512_s3 + $0x50] sm:$0xff] }
 0x20e   :  { %1026 = vmatmul.msk.f32.vlgmr.msra.gmra.mxu3 %vm126_vm1, %v199_v53  ;;  %v1072_v53 = vld [vmem:[%s1512_s3 + $0x58] sm:$0xff] }
 0x213   :  { %v1127_v55 = vpop.eup %1126 }
 0x214   :  { %v200_v56 = vmul.f32 %v1127_v55, %v1123_v39 }
 0x216   :  { %1027 = vmatmul.msk.f32.vlgmr.msrb.gmra.mxu0 %vm126_vm1, %v200_v56  ;;  %1040 = vmatmul.msk.f32.vlgmr.msrb.gmra.mxu3 %vm40_vm0, %v1244_v8 }
 0x21e   :  { %1041 = vmatmul.msk.f32.gmra.mxu3 %vm40_vm0, %v1249_v9  ;;  %1046 = vmatmul.msk.f32.vlgmr.msra.gmra.mxu0 %vm40_vm0, %v1244_v8 }
 0x226   :  { %1047 = vmatmul.msk.f32.gmra.mxu0 %vm40_vm0, %v1249_v9 }
 0x291   :  { %v221_v58 = vpop.f32.mrf.mxu3 }
 0x292   :  { %1028 = vmatmul.msk.f32.vlgmr.msrb.gmra.mxu1 %vm126_vm1, %v221_v58 }
 0x293   :  { %v244_v60 = vpop.f32.mrf.mxu0 }
 0x299   :  { %v331_v61 = vpop.f32.mrf.mxu3 }
 0x29a   :  { %1029 = vmatmul.msk.f32.gmra.mxu1 %vm126_vm1, %v244_v60 }
 0x29b   :  { %1048 = vmatpush.xpose.msk.msra.mxu1 %vm126_vm1, %v331_v61  ;;  %v359_v27 = vpop.f32.mrf.mxu0 }
 0x29c   :  { %457 = vmatpush.msra.mxu3 %v359_v27  ;;  %v1084_v27 = vld [vmem:[%s1510_s1 + $0x60] sm:$0xff] }
 0x29e   :  { %565 = vmatpush.msrb.mxu3 %v1066_v28 }
 0x29f   :  { %508 = vmatpush.msrb.mxu1 %v1054_v43  ;;  %v1099_v43 = vld [vmem:[%s1512_s3 + $0x78] sm:$0xff] }
 0x2a0   :  { %566 = vmatpush.msrb.mxu3 %v1065_v30 }
 0x2a1   :  { %v334_v0 = vpop.f32.mrf.mxu3 }
 0x2a2   :  { %1049 = vmatmul.msk.f32.vlgmr.msra.gmra.mxu1 %vm126_vm1, %v307_v62  ;;  %1050 = vmatpush.xpose.msk.msrb.mxu2 %vm126_vm1, %v334_v0 }
 0x2a3   :  { %567 = vmatpush.msrb.mxu3 %v1064_v32  ;;  %v362_v35 = vpop.f32.mrf.mxu0 }
 0x2a4   :  { %480 = vmatpush.msrb.mxu0 %v362_v35 }
 0x2a5   :  { %1051 = vmatmul.msk.f32.vlgmr.msrb.gmra.mxu2 %vm126_vm1, %v308_v1  ;;  %568 = vmatpush.msrb.mxu3 %v1063_v34  ;;  %v1081_v34 = vld [vmem:[%s1513_s4 + $0x10] sm:$0xff] }
 0x2a6   :  { %535 = vmatpush.msra.mxu2 %v1060_v29  ;;  %593 = vmatpush.msra.mxu0 %v1072_v53 }
 0x2a8   :  { %536 = vmatpush.msra.mxu2 %v1059_v31  ;;  %594 = vmatpush.msra.mxu0 %v1071_v54 }
 0x2aa   :  { %537 = vmatpush.msra.mxu2 %v1058_v33  ;;  %595 = vmatpush.msra.mxu0 %v1070_v3 }
 0x2ac   :  { %538 = vmatpush.msra.mxu2 %v1057_v36 }
 0x2ad   :  { %1061 = vmatmul.msk.f32.vlgmr.msra.gmra.mxu2 %vm40_vm0, %v1244_v8 }
 0x2b5   :  { %1062 = vmatmul.msk.f32.gmra.mxu2 %vm40_vm0, %v1249_v9 }
 0x30f   :  { %v1336_v4 = vpop.f32.mrf.mxu1 }
 0x310   :  { %v277_v55 = vadd.f32 %v1119_v52, %v1336_v4  ;;  %v1069_v4 = vld [vmem:[%s1512_s3 + $0x40] sm:$0xff] }
 0x311   :  { %596 = vmatpush.msra.mxu0 %v1069_v4 }
 0x317   :  { %v1338_v5 = vpop.f32.mrf.mxu1 }
 0x318   :  { %v278_v58 = vadd.f32 %v1119_v52, %v1338_v5 }
 0x31f   :  { %v388_v6 = vpop.f32.mrf.mxu1 }
 0x320   :  { %v389_v7 = vadd.f32 %v388_v6, %v1269_v22 }
 0x322   :  { %v417_v10 = vsel %vm126_vm1, %v389_v7, -inf }
 0x323   :  { %418 = vmax.xlane.f32.xlu2 %v417_v10 }
 0x328   :  { %v414_v11 = vpop.f32.mrf.mxu2 }
 0x329   :  { %v415_v12 = vadd.f32 %v414_v11, %v1269_v22 }
 0x32b   :  { %v420_v13 = vsel %vm126_vm1, %v415_v12, -inf }
 0x32c   :  { %421 = vmax.xlane.f32.xlu2 %v420_v13 }
 0x330   :  { %v540_v45 = vpop.f32.mrf.mxu2 }
 0x331   :  { %v546_v48 = vmul.f32 0.17677669, %v540_v45 }
 0x338   :  { %v543_v49 = vpop.f32.mrf.mxu2 }
 0x339   :  { %v547_v51 = vmul.f32 0.17677669, %v543_v49 }
 0x396   :  { %v419_v16 = vpop.xlane.xlu2 %418 }
 0x397   :  { %v423_v17 = vsub.f32 %v389_v7, %v419_v16 }
 0x399   :  { %v425_v18 = vmul.f32 1.442695, %v423_v17 }
 0x39b   :  { %1128 = vpow2.f32 %v425_v18  ;;  %v1093_v18 = vld [vmem:[%s1511_s2 + $0x78] sm:$0xff] }
 0x39f   :  { %v422_v19 = vpop.xlane.xlu2 %421 }
 0x3a0   :  { %v424_v20 = vsub.f32 %v415_v12, %v422_v19  ;;  %v1087_v19 = vld [vmem:[%s1510_s1 + $0x78] sm:$0xff] }
 0x3a1   :  { %v1129_v21 = vpop.eup %1128 }
 0x3a2   :  { %v427_v23 = vmul.f32 1.442695, %v424_v20  ;;  %v429_v24 = vsel %vm126_vm1, %v1129_v21, 0.0  ;;  %v1092_v20 = vld [vmem:[%s1511_s2 + $0x70] sm:$0xff] }
 0x3a3   :  { %430 = vadd.xlane.f32.xlu0 %v429_v24  ;;  %v1085_v24 = vld [vmem:[%s1510_s1 + $0x68] sm:$0xff] }
 0x3a4   :  { %1130 = vpow2.f32 %v427_v23  ;;  %v1091_v23 = vld [vmem:[%s1511_s2 + $0x68] sm:$0xff] }
 0x3aa   :  { %v1131_v25 = vpop.eup %1130 }
 0x3ab   :  { %v432_v26 = vsel %vm126_vm1, %v1131_v25, 0.0 }
 0x3ac   :  { %433 = vadd.xlane.f32.xlu1 %v432_v26 }
 0x416   :  { %v431_v37 = vpop.xlane.xlu0 %430 }
 0x417   :  { %1132 = vrcp.f32 %v431_v37 }
 0x41d   :  { %v1133_v38 = vpop.eup %1132 }
 0x41e   :  { %v437_v39 = vmul.f32 %v1133_v38, %v1129_v21  ;;  %v1086_v21 = vld [vmem:[%s1510_s1 + $0x70] sm:$0xff] }
 0x41f   :  { %v434_v40 = vpop.xlane.xlu1 %433 }
 0x420   :  { %1134 = vrcp.f32 %v434_v40  ;;  %1052 = vmatmul.msk.f32.vlgmr.msra.gmra.mxu3 %vm126_vm1, %v437_v39 }
 0x426   :  { %v1135_v41 = vpop.eup %1134 }
 0x427   :  { %v438_v42 = vmul.f32 %v1135_v41, %v1131_v25  ;;  %v1090_v25 = vld [vmem:[%s1511_s2 + $0x60] sm:$0xff] }
 0x428   :  { %1067 = vmatmul.msk.f32.vlgmr.msrb.gmra.mxu3 %vm40_vm0, %v1244_v8 }
 0x429   :  { %1053 = vmatmul.msk.f32.vlgmr.msrb.gmra.mxu0 %vm126_vm1, %v438_v42 }
 0x430   :  { %1068 = vmatmul.msk.f32.gmra.mxu3 %vm40_vm0, %v1249_v9 }
 0x431   :  { %1073 = vmatmul.msk.f32.vlgmr.msra.gmra.mxu0 %vm40_vm0, %v1244_v8 }
 0x439   :  { %1074 = vmatmul.msk.f32.gmra.mxu0 %vm40_vm0, %v1249_v9 }
 0x4a3   :  { %v459_v44 = vpop.f32.mrf.mxu3 }
 0x4a4   :  { %1055 = vmatmul.msk.f32.vlgmr.msrb.gmra.mxu1 %vm126_vm1, %v459_v44  ;;  %v1098_v44 = vld [vmem:[%s1512_s3 + $0x70] sm:$0xff] }
 0x4a6   :  { %v482_v46 = vpop.f32.mrf.mxu0 }
 0x4ab   :  { %v570_v47 = vpop.f32.mrf.mxu3 }
 0x4ac   :  { %1056 = vmatmul.msk.f32.gmra.mxu1 %vm126_vm1, %v482_v46 }
 0x4ad   :  { %1075 = vmatpush.xpose.msk.msra.mxu1 %vm126_vm1, %v570_v47 }
 0x4ae   :  { %v598_v17 = vpop.f32.mrf.mxu0 }
 0x4af   :  { %696 = vmatpush.msra.mxu3 %v598_v17 }
 0x4b1   :  { %804 = vmatpush.msrb.mxu3 %v1093_v18  ;;  %747 = vmatpush.msrb.mxu1 %v1081_v34 }
 0x4b3   :  { %v573_v50 = vpop.f32.mrf.mxu3  ;;  %805 = vmatpush.msrb.mxu3 %v1092_v20 }
 0x4b4   :  { %1076 = vmatmul.msk.f32.vlgmr.msra.gmra.mxu1 %vm126_vm1, %v546_v48  ;;  %1077 = vmatpush.xpose.msk.msrb.mxu2 %vm126_vm1, %v573_v50 }
 0x4b5   :  { %806 = vmatpush.msrb.mxu3 %v1091_v23 }
 0x4b6   :  { %v601_v26 = vpop.f32.mrf.mxu0 }
 0x4b7   :  { %1078 = vmatmul.msk.f32.vlgmr.msrb.gmra.mxu2 %vm126_vm1, %v547_v51  ;;  %807 = vmatpush.msrb.mxu3 %v1090_v25 }
 0x4b8   :  { %774 = vmatpush.msra.mxu2 %v1087_v19  ;;  %719 = vmatpush.msrb.mxu0 %v601_v26 }
 0x4ba   :  { %775 = vmatpush.msra.mxu2 %v1086_v21  ;;  %832 = vmatpush.msra.mxu0 %v1099_v43 }
 0x4bc   :  { %776 = vmatpush.msra.mxu2 %v1085_v24  ;;  %833 = vmatpush.msra.mxu0 %v1098_v44 }
 0x4be   :  { %777 = vmatpush.msra.mxu2 %v1084_v27 }
 0x4bf   :  { %1088 = vmatmul.msk.f32.vlgmr.msra.gmra.mxu2 %vm40_vm0, %v1244_v8 }
 0x4c7   :  { %1089 = vmatmul.msk.f32.gmra.mxu2 %vm40_vm0, %v1249_v9 }
 0x521   :  { %v510_v56 = vpop.f32.mrf.mxu1 }
 0x522   :  { %v1409_v57 = vadd.f32 %v510_v56, %v277_v55  ;;  %v1097_v55 = vld [vmem:[%s1512_s3 + $0x68] sm:$0xff]  ;;  %v1096_v56 = vld [vmem:[%s1512_s3 + $0x60] sm:$0xff] }
 0x523   :  { %834 = vmatpush.msra.mxu0 %v1097_v55 }
 0x525   :  { %835 = vmatpush.msra.mxu0 %v1096_v56 }
 0x529   :  { %v513_v59 = vpop.f32.mrf.mxu1 }
 0x52a   :  { %v1412_v60 = vadd.f32 %v513_v59, %v278_v58 }
 0x531   :  { %v627_v61 = vpop.f32.mrf.mxu1 }
 0x532   :  { %v628_v62 = vadd.f32 %v627_v61, %v1269_v22 }
 0x534   :  { %v656_v63 = vsel %vm126_vm1, %v628_v62, -inf }
 0x535   :  { %657 = vmax.xlane.f32.xlu2 %v656_v63 }
 0x53a   :  { %v653_v0 = vpop.f32.mrf.mxu2 }
 0x53b   :  { %v654_v1 = vadd.f32 %v653_v0, %v1269_v22 }
 0x53d   :  { %v659_v2 = vsel %vm126_vm1, %v654_v1, -inf }
 0x53e   :  { %660 = vmax.xlane.f32.xlu0 %v659_v2 }
 0x542   :  { %v779_v36 = vpop.f32.mrf.mxu2 }
 0x543   :  { %v785_v39 = vmul.f32 0.17677669, %v779_v36 }
 0x54a   :  { %v782_v40 = vpop.f32.mrf.mxu2 }
 0x54b   :  { %v786_v42 = vmul.f32 0.17677669, %v782_v40 }
 0x5a8   :  { %v658_v5 = vpop.xlane.xlu2 %657 }
 0x5a9   :  { %v662_v6 = vsub.f32 %v628_v62, %v658_v5 }
 0x5ab   :  { %v664_v7 = vmul.f32 1.442695, %v662_v6 }
 0x5ad   :  { %1136 = vpow2.f32 %v664_v7 }
 0x5b1   :  { %v661_v10 = vpop.xlane.xlu0 %660 }
 0x5b2   :  { %v663_v11 = vsub.f32 %v654_v1, %v661_v10  ;;  %v1108_v10 = vld [vmem:[%s1513_s4 + $0x18] sm:$0xff]  ;;  %s1180_s4 = smov 128  }
 0x5b3   :  { %v1137_v12 = vpop.eup %1136 }
 0x5b4   :  { %v666_v13 = vmul.f32 1.442695, %v663_v11  ;;  %v668_v14 = vsel %vm126_vm1, %v1137_v12, 0.0 }
 0x5b5   :  { %669 = vadd.xlane.f32.xlu1 %v668_v14 }
 0x5b6   :  { %1138 = vpow2.f32 %v666_v13 }
 0x5bc   :  { %v1139_v15 = vpop.eup %1138 }
 0x5bd   :  { %v671_v16 = vsel %vm126_vm1, %v1139_v15, 0.0 }
 0x5be   :  { %672 = vadd.xlane.f32.xlu2 %v671_v16 }
 0x628   :  { %v670_v28 = vpop.xlane.xlu1 %669 }
 0x629   :  { %1140 = vrcp.f32 %v670_v28 }
 0x62f   :  { %v1141_v29 = vpop.eup %1140 }
 0x630   :  { %v676_v30 = vmul.f32 %v1141_v29, %v1137_v12 }
 0x631   :  { %v673_v31 = vpop.xlane.xlu2 %672 }
 0x632   :  { %1142 = vrcp.f32 %v673_v31  ;;  %1079 = vmatmul.msk.f32.vlgmr.msra.gmra.mxu3 %vm126_vm1, %v676_v30 }
 0x638   :  { %v1143_v32 = vpop.eup %1142 }
 0x639   :  { %v677_v33 = vmul.f32 %v1143_v32, %v1139_v15 }
 0x63a   :  { %1094 = vmatmul.msk.f32.vlgmr.msrb.gmra.mxu3 %vm40_vm0, %v1244_v8 }
 0x63b   :  { %1080 = vmatmul.msk.f32.vlgmr.msrb.gmra.mxu0 %vm126_vm1, %v677_v33 }
 0x642   :  { %1095 = vmatmul.msk.f32.gmra.mxu3 %vm40_vm0, %v1249_v9 }
 0x643   :  { %1100 = vmatmul.msk.f32.vlgmr.msra.gmra.mxu0 %vm40_vm0, %v1244_v8 }
 0x64b   :  { %1101 = vmatmul.msk.f32.gmra.mxu0 %vm40_vm0, %v1249_v9 }
 0x6b5   :  { %v698_v35 = vpop.f32.mrf.mxu3 }
 0x6b6   :  { %1082 = vmatmul.msk.f32.vlgmr.msrb.gmra.mxu1 %vm126_vm1, %v698_v35 }
 0x6b8   :  { %v721_v37 = vpop.f32.mrf.mxu0 }
 0x6bd   :  { %v809_v38 = vpop.f32.mrf.mxu3 }
 0x6be   :  { %1083 = vmatmul.msk.f32.gmra.mxu1 %vm126_vm1, %v721_v37 }
 0x6bf   :  { %1102 = vmatpush.xpose.msk.msra.mxu1 %vm126_vm1, %v809_v38 }
 0x6c0   :  { %v837_v8 = vpop.f32.mrf.mxu0 }
 0x6c1   :  { %935 = vmatpush.msra.mxu3 %v837_v8 }
 0x6c3   :  { %986 = vmatpush.msrb.mxu1 %v1108_v10 }
 0x6c5   :  { %v812_v41 = vpop.f32.mrf.mxu3 }
 0x6c6   :  { %1103 = vmatmul.msk.f32.vlgmr.msra.gmra.mxu1 %vm126_vm1, %v785_v39  ;;  %1104 = vmatpush.xpose.msk.msrb.mxu2 %vm126_vm1, %v812_v41 }
 0x6c8   :  { %v840_v2 = vpop.f32.mrf.mxu0 }
 0x6c9   :  { %1105 = vmatmul.msk.f32.vlgmr.msrb.gmra.mxu2 %vm126_vm1, %v786_v42  ;;  %958 = vmatpush.msrb.mxu0 %v840_v2 }
 0x733   :  { %v749_v45 = vpop.f32.mrf.mxu1 }
 0x734   :  { %v755_v46 = vadd.f32 %v749_v45, %v1409_v57 }
 0x73b   :  { %v752_v47 = vpop.f32.mrf.mxu1 }
 0x73c   :  { %v756_v48 = vadd.f32 %v752_v47, %v1412_v60 }
 0x743   :  { %v866_v49 = vpop.f32.mrf.mxu1 }
 0x744   :  { %v867_v50 = vadd.f32 %v866_v49, %v1269_v22 }
 0x746   :  { %v895_v51 = vsel %vm126_vm1, %v867_v50, -inf }
 0x747   :  { %896 = vmax.xlane.f32.xlu0 %v895_v51 }
 0x74c   :  { %v892_v52 = vpop.f32.mrf.mxu2 }
 0x74d   :  { %v893_v53 = vadd.f32 %v892_v52, %v1269_v22 }
 0x74f   :  { %v898_v54 = vsel %vm126_vm1, %v893_v53, -inf }
 0x750   :  { %899 = vmax.xlane.f32.xlu1 %v898_v54 }
 0x7ba   :  { %v897_v22 = vpop.xlane.xlu0 %896 }
 0x7bb   :  { %v901_v57 = vsub.f32 %v867_v50, %v897_v22 }
 0x7bd   :  { %v903_v58 = vmul.f32 1.442695, %v901_v57 }
 0x7bf   :  { %1144 = vpow2.f32 %v903_v58 }
 0x7c3   :  { %v900_v59 = vpop.xlane.xlu1 %899 }
 0x7c4   :  { %v902_v60 = vsub.f32 %v893_v53, %v900_v59 }
 0x7c5   :  { %v1145_v61 = vpop.eup %1144 }
 0x7c6   :  { %v905_v62 = vmul.f32 1.442695, %v902_v60  ;;  %v907_v63 = vsel %vm126_vm1, %v1145_v61, 0.0 }
 0x7c7   :  { %908 = vadd.xlane.f32.xlu2 %v907_v63 }
 0x7c8   :  { %1146 = vpow2.f32 %v905_v62 }
 0x7ce   :  { %v1147_v0 = vpop.eup %1146 }
 0x7cf   :  { %v910_v1 = vsel %vm126_vm1, %v1147_v0, 0.0 }
 0x7d0   :  { %911 = vadd.xlane.f32.xlu0 %v910_v1 }
 0x83a   :  { %v909_v9 = vpop.xlane.xlu2 %908 }
 0x83b   :  { %1148 = vrcp.f32 %v909_v9 }
 0x841   :  { %v1149_v3 = vpop.eup %1148 }
 0x842   :  { %v915_v4 = vmul.f32 %v1149_v3, %v1145_v61 }
 0x843   :  { %v912_v5 = vpop.xlane.xlu0 %911 }
 0x844   :  { %1150 = vrcp.f32 %v912_v5  ;;  %1106 = vmatmul.msk.f32.vlgmr.msra.gmra.mxu3 %vm126_vm1, %v915_v4 }
 0x84a   :  { %v1151_v6 = vpop.eup %1150 }
 0x84b   :  { %v916_v7 = vmul.f32 %v1151_v6, %v1147_v0 }
 0x84d   :  { %1107 = vmatmul.msk.f32.vlgmr.msrb.gmra.mxu0 %vm126_vm1, %v916_v7 }
 0x8c7   :  { %v937_v11 = vpop.f32.mrf.mxu3 }
 0x8c8   :  { %1109 = vmatmul.msk.f32.vlgmr.msrb.gmra.mxu1 %vm126_vm1, %v937_v11 }
 0x8ca   :  { %v960_v12 = vpop.f32.mrf.mxu0 }
 0x8d0   :  { %1110 = vmatmul.msk.f32.gmra.mxu1 %vm126_vm1, %v960_v12 }
 0x945   :  { %v988_v13 = vpop.f32.mrf.mxu1 }
 0x946   :  { %v994_v14 = vadd.f32 %v988_v13, %v755_v46 }
 0x948   :  { %996 = vst.msk [vmem:[#allocation2] sm:$0xff] %vm40_vm0, %v994_v14 }
 0x94d   :  { %v991_v15 = vpop.f32.mrf.mxu1 }
 0x94e   :  { %v995_v16 = vadd.f32 %v991_v15, %v756_v48 }
 0x950   :  { %997 = vst.msk [vmem:[#allocation2 + $0x8] sm:$0xff] %vm40_vm0, %v995_v16 }
 0x951   :  { %1010 = dma.vmem_to_hbm [thread:$0]  %s1003_s27, 256, %s1005_s30, [#allocation3], %s1180_s4, %s1180_s4, %s1181_s7  }
 0x952   :  { %1176 = dma.done.wait [#allocation3], 256  }
 0x953   :  { %1177 = vsyncadd [#allocation3], 4294967040 }
 0x954   :  { %1015 = vsyncpa [#allocation3], 1 }

</bundles_post_ra>
